<compile_context>
chip_gen: v7x
topology: tpu7x:2x2x1
jax: 0.10.0
libtpu: 0.0.40
codegen_flags: <defaults>
</compile_context>

<pallas_src>
import jax
import jax.numpy as jnp
from jax.experimental import pallas as pl
from jax.experimental.pallas import tpu as pltpu


def _round_up(x, m):
    return ((x + m - 1) // m) * m


def _discriminator_kernel(x_ref, w1_ref, b1_ref, w2_ref, b2_ref, o_ref):
    # Gradient reversal is identity in the forward pass, so x is used as-is.
    x = x_ref[...].astype(jnp.float32)                                 # [tile_b, in_dim]
    h = jnp.dot(x, w1_ref[...], preferred_element_type=jnp.float32)   # MXU, f32 accumulate
    h = jnp.maximum(h + b1_ref[...], 0.0)                             # bias + ReLU
    # dropout1: identity (inference)
    out = jnp.dot(h, w2_ref[...], preferred_element_type=jnp.float32)
    out = out + b2_ref[...]
    # dropout2: identity (inference)
    o_ref[...] = out.astype(o_ref.dtype)


def discriminator_forward(feature_output, alpha, w1, b1, w2, b2, *, tile_b=4096):
    """Forward pass of the Discriminator head.

    feature_output: [B, K*lstm_hidden_dim]
    alpha:          scalar (unused in forward; only affects ReverseLayerF backward)
    w1: [in_dim, hidden]   (transpose of PyTorch dense1.weight)
    b1: [hidden]
    w2: [hidden, domain]   (transpose of PyTorch dense2.weight)
    b2: [domain]
    """
    del alpha  # identity in the forward pass
    B, in_dim = feature_output.shape
    hidden = w1.shape[1]
    domain = w2.shape[1]
    out_dtype = feature_output.dtype

    w1 = w1.astype(jnp.float32)
    b1 = b1.reshape(1, hidden).astype(jnp.float32)
    w2 = w2.astype(jnp.float32)
    b2 = b2.reshape(1, domain).astype(jnp.float32)

    # Batch tile: multiple of 8 sublanes (or the full batch if tiny), large enough to
    # amortise per-step overhead, and capped so the grid has >= 2 steps whenever B allows
    # (keeps both v7x TensorCores busy under dimension_semantics=("parallel",)).
    if B <= 8:
        tile_b = B
    else:
        two_step_cap = _round_up(pl.cdiv(B, 2), 8)
        tile_b = max(8, min(tile_b, two_step_cap))
    grid = (pl.cdiv(B, tile_b),)

    cost = pl.CostEstimate(
        flops=2 * B * in_dim * hidden + 2 * B * hidden * domain,
        transcendentals=0,
        bytes_accessed=(feature_output.size * feature_output.dtype.itemsize
                        + w1.size * 4 + w2.size * 4 + b1.size * 4 + b2.size * 4
                        + B * domain * jnp.dtype(out_dtype).itemsize),
    )

    return pl.pallas_call(
        _discriminator_kernel,
        out_shape=jax.ShapeDtypeStruct((B, domain), out_dtype),
        grid=grid,
        in_specs=[
            pl.BlockSpec((tile_b, in_dim), lambda i: (i, 0)),   # x: tiled over batch
            pl.BlockSpec((in_dim, hidden), lambda i: (0, 0)),   # w1: VMEM-resident
            pl.BlockSpec((1, hidden), lambda i: (0, 0)),        # b1: resident
            pl.BlockSpec((hidden, domain), lambda i: (0, 0)),   # w2: resident
            pl.BlockSpec((1, domain), lambda i: (0, 0)),        # b2: resident
        ],
        out_specs=pl.BlockSpec((tile_b, domain), lambda i: (i, 0)),
        compiler_params=pltpu.CompilerParams(
            dimension_semantics=("parallel",),
        ),
        cost_estimate=cost,
    )(feature_output, w1, b1, w2, b2)


if __name__ == "__main__":
    # Small shapes consistent with the module:
    #   K=4, lstm_hidden_dim=8  -> in_dim = K*lstm_hidden_dim = 32
    #   dense_hidden_dim=32, domain_num=4, batch=8
    B = 8
    K = 4
    lstm_hidden_dim = 8
    dense_hidden_dim = 32
    domain_num = 4
    in_dim = K * lstm_hidden_dim

    key = jax.random.PRNGKey(0)
    kx, kw1, kb1, kw2, kb2 = jax.random.split(key, 5)

    feature_output = jax.random.normal(kx, (B, in_dim), dtype=jnp.float32)
    alpha = 1.0

    # Deterministic parameter init (PyTorch nn.Linear-style uniform ranges).
    bound1 = 1.0 / (in_dim ** 0.5)
    w1 = jax.random.uniform(kw1, (in_dim, dense_hidden_dim), jnp.float32, -bound1, bound1)
    b1 = jax.random.uniform(kb1, (dense_hidden_dim,), jnp.float32, -bound1, bound1)

    bound2 = 1.0 / (dense_hidden_dim ** 0.5)
    w2 = jax.random.uniform(kw2, (dense_hidden_dim, domain_num), jnp.float32, -bound2, bound2)
    b2 = jax.random.uniform(kb2, (domain_num,), jnp.float32, -bound2, bound2)

    out = discriminator_forward(feature_output, alpha, w1, b1, w2, b2)
    out = jax.block_until_ready(out)

    # Pure-JAX f32 reference (kernel is f32 end-to-end -> tight tolerance).
    ref = jnp.maximum(feature_output @ w1 + b1[None, :], 0.0) @ w2 + b2[None, :]
    assert out.shape == (B, domain_num), out.shape
    assert jnp.allclose(out, ref, atol=1e-2, rtol=1e-2), "mismatch vs reference"

    print("KERNEL_OK")
</pallas_src>

<mosaic_0001>
module attributes {stable_mosaic.version = 11 : i64} {
  func.func @_discriminator_kernel(%arg0: i32, %arg1: memref<8x32xf32, #tpu.memory_space<vmem>>, %arg2: memref<32x32xf32, #tpu.memory_space<vmem>>, %arg3: memref<1x32xf32, #tpu.memory_space<vmem>>, %arg4: memref<32x4xf32, #tpu.memory_space<vmem>>, %arg5: memref<1x4xf32, #tpu.memory_space<vmem>>, %arg6: memref<8x4xf32, #tpu.memory_space<vmem>>) attributes {dimension_semantics = [#tpu.dimension_semantics<parallel>], iteration_bounds = array<i64: 1>, scalar_prefetch = 0 : i64, scratch_operands = 0 : i64, tpu.core_type = #tpu.core_type<tc>, window_params = [{transform_indices = @transform_0, window_bounds = array<i64: 8, 32>}, {pipeline_mode = #tpu.pipeline_mode<synchronous>, transform_indices = @transform_1, window_bounds = array<i64: 32, 32>}, {pipeline_mode = #tpu.pipeline_mode<synchronous>, transform_indices = @transform_2, window_bounds = array<i64: 1, 32>}, {pipeline_mode = #tpu.pipeline_mode<synchronous>, transform_indices = @transform_3, window_bounds = array<i64: 32, 4>}, {pipeline_mode = #tpu.pipeline_mode<synchronous>, transform_indices = @transform_4, window_bounds = array<i64: 1, 4>}, {transform_indices = @transform_5, window_bounds = array<i64: 8, 4>}]} {
    %c0 = arith.constant 0 : index
    %c0_0 = arith.constant 0 : index
    %0 = vector.load %arg1[%c0, %c0_0] : memref<8x32xf32, #tpu.memory_space<vmem>>, vector<8x32xf32>
    %c0_1 = arith.constant 0 : index
    %c0_2 = arith.constant 0 : index
    %1 = vector.load %arg2[%c0_1, %c0_2] : memref<32x32xf32, #tpu.memory_space<vmem>>, vector<32x32xf32>
    %cst = arith.constant dense<0.000000e+00> : vector<8x32xf32>
    %2 = tpu.matmul %0, %1, %cst {dimension_numbers = #tpu.dot_dimension_numbers<[1], [0], [0], [1], [0, 0, 1, 1], [], []>} : vector<8x32xf32>, vector<32x32xf32>, vector<8x32xf32> -> vector<8x32xf32>
    %c0_3 = arith.constant 0 : index
    %c0_4 = arith.constant 0 : index
    %3 = vector.load %arg3[%c0_3, %c0_4] : memref<1x32xf32, #tpu.memory_space<vmem>>, vector<1x32xf32>
    %4 = vector.broadcast %3 : vector<1x32xf32> to vector<8x32xf32>
    %5 = arith.addf %2, %4 : vector<8x32xf32>
    %cst_5 = arith.constant 0.000000e+00 : f32
    %6 = vector.broadcast %cst_5 : f32 to vector<8x32xf32>
    %7 = arith.maximumf %5, %6 : vector<8x32xf32>
    %c0_6 = arith.constant 0 : index
    %c0_7 = arith.constant 0 : index
    %8 = vector.load %arg4[%c0_6, %c0_7] : memref<32x4xf32, #tpu.memory_space<vmem>>, vector<32x4xf32>
    %cst_8 = arith.constant dense<0.000000e+00> : vector<8x4xf32>
    %9 = tpu.matmul %7, %8, %cst_8 {dimension_numbers = #tpu.dot_dimension_numbers<[1], [0], [0], [1], [0, 0, 1, 1], [], []>} : vector<8x32xf32>, vector<32x4xf32>, vector<8x4xf32> -> vector<8x4xf32>
    %c0_9 = arith.constant 0 : index
    %c0_10 = arith.constant 0 : index
    %10 = vector.load %arg5[%c0_9, %c0_10] : memref<1x4xf32, #tpu.memory_space<vmem>>, vector<1x4xf32>
    %11 = vector.broadcast %10 : vector<1x4xf32> to vector<8x4xf32>
    %12 = arith.addf %9, %11 : vector<8x4xf32>
    %c0_11 = arith.constant 0 : index
    %c0_12 = arith.constant 0 : index
    %13 = vector.load %arg6[%c0_11, %c0_12] : memref<8x4xf32, #tpu.memory_space<vmem>>, vector<8x4xf32>
    tpu.vector_store %arg6[%c0_11, %c0_12], %12 {strides = array<i32>} : memref<8x4xf32, #tpu.memory_space<vmem>>, vector<8x4xf32>,
    return
  }
  func.func @transform_0(%arg0: i32) -> (i32, i32) {
    %c0_i32 = arith.constant 0 : i32
    %c0_i32_0 = arith.constant 0 : i32
    return %arg0, %c0_i32 : i32, i32
  }
  func.func @transform_1(%arg0: i32) -> (i32, i32) {
    %c0_i32 = arith.constant 0 : i32
    %c0_i32_0 = arith.constant 0 : i32
    %c0_i32_1 = arith.constant 0 : i32
    return %c0_i32, %c0_i32_0 : i32, i32
  }
  func.func @transform_2(%arg0: i32) -> (i32, i32) {
    %c0_i32 = arith.constant 0 : i32
    %c0_i32_0 = arith.constant 0 : i32
    %c0_i32_1 = arith.constant 0 : i32
    return %c0_i32, %c0_i32_0 : i32, i32
  }
  func.func @transform_3(%arg0: i32) -> (i32, i32) {
    %c0_i32 = arith.constant 0 : i32
    %c0_i32_0 = arith.constant 0 : i32
    %c0_i32_1 = arith.constant 0 : i32
    return %c0_i32, %c0_i32_0 : i32, i32
  }
  func.func @transform_4(%arg0: i32) -> (i32, i32) {
    %c0_i32 = arith.constant 0 : i32
    %c0_i32_0 = arith.constant 0 : i32
    %c0_i32_1 = arith.constant 0 : i32
    return %c0_i32, %c0_i32_0 : i32, i32
  }
  func.func @transform_5(%arg0: i32) -> (i32, i32) {
    %c0_i32 = arith.constant 0 : i32
    %c0_i32_0 = arith.constant 0 : i32
    return %arg0, %c0_i32 : i32, i32
  }
}

</mosaic_0001>

<bundles_post_ra>
// kernel: tpu_custom_call.1
= control target key start
LH: loop header
LB: loop body
LE: loop exit
PB: predicated region body
PF: predicated region fallthrough
CT: control target
= control target key end

     0   :  { %10 = vsyncpa [#allocation3], 0  ;;  %s286_s18 = smov [#allocation2]   ;;  %s365_s0 = inlined_call_operand.hbm [shape: f32[8,32], index: 0, kind: input, shape index: {}]   ;;  %s366_s1 = inlined_call_operand.vmem [shape: f32[32,32], index: 1, kind: input, shape index: {}]   ;;  %s367_s2 = inlined_call_operand.vmem [shape: f32[1,32], index: 2, kind: input, shape index: {}]   ;;  %s368_s3 = inlined_call_operand.vmem [shape: f32[32,4], index: 3, kind: input, shape index: {}]   ;;  %s369_s4 = inlined_call_operand.vmem [shape: f32[1,4], index: 4, kind: input, shape index: {}]   ;;  %s370_s5 = inlined_call_operand.vmem [shape: f32[8,4], index: 5, kind: output, shape index: {}]  }
   0x1   :  { %s17_s19 = sshll.u32 %s286_s18, 4  ;;  %s262_s22 = scalar_lea.hbm %s365_s0, 128  ;;  %s18_s19 = int_to_ptr.vmem [resolvable:$true] %s17_s19 }
   0x2   :  { %p263_p0 = scmp.ne.s32.totalorder %s365_s0, %s262_s22  ;;  %p266_p1 = scmp.lt.u32.totalorder %s262_s22, %s365_s0 }
   0x4   :  { %p268_p2 = pnand %p266_p1, %p263_p0 }
   0x6   :  { %271 = shalt.err (!%p268_p2)
}
   0x7   :  { %s272_s27 = scalar_lea.vmem %s18_s19, 128  ;;  %p277_p4 = scmp.lt.s32.totalorder %s18_s19, %s18_s19 }
   0x8   :  { %p273_p3 = scmp.ne.s32.totalorder %s18_s19, %s272_s27  ;;  %p278_p5 = scmp.lt.s32.totalorder %s272_s27, %s272_s27 }
   0xa   :  { %p279_p6 = por %p278_p5, %p277_p4 }
   0xc   :  { %p280_p7 = pnand %p279_p6, %p273_p3 }
   0xe   :  { %283 = shalt.err (!%p280_p7)
}
   0xf   :  { %20 = dma.hbm_to_vmem [thread:$0]  %s365_s0, 128, %s18_s19, [#allocation3]  }
  0x10   :  { %284 = dma.done.wait [#allocation3], 128  }
  0x11   :  { %285 = vsyncadd [#allocation3], 4294967168  ;;  %v287_v0 = vmov 0.0|0.0   ;;  %vm288_vm0 = vmmov 0   ;;  %v289_v1 = vmov 0.0   ;;  %v33_v2 = vld [vmem:[%s366_s1] sm:$0xff] }
  0x12   :  { %246 = vmatprep.subr.bf16.mxu0 %v287_v0  ;;  %232 = vmatprep.mubr.msk.f32.mxu0 %vm288_vm0, %v289_v1  ;;  %v34_v3 = vld [vmem:[%s366_s1 + $0x8] sm:$0xff]  ;;  %v35_v4 = vld [vmem:[%s366_s1 + $0x10] sm:$0xff]  ;;  %v36_v6 = vld [vmem:[%s366_s1 + $0x18] sm:$0xff]  ;;  %vm44_vm1 = vcmask 261120   ;;  %vm203_vm2 = vcmask 31744  }
  0x13   :  { %252 = vmatprep.subr.bf16.mxu1 %v287_v0  ;;  %243 = vmatprep.mubr.msk.f32.mxu1 %vm288_vm0, %v289_v1  ;;  %v247_v5 = vpack.c.bf16 %v34_v3, %v33_v2  ;;  %v119_v7 = vld [vmem:[%s368_s3] sm:$0xff]  ;;  %v120_v8 = vld [vmem:[%s368_s3 + $0x8] sm:$0xff]  ;;  %v250_v9 = vpack.c.bf16 %v36_v6, %v35_v4  ;;  %v121_v12 = vld [vmem:[%s368_s3 + $0x10] sm:$0xff] }
  0x14   :  { %v253_v10 = vpack.c.bf16 %v120_v8, %v119_v7  ;;  %v32_v11 = vld [vmem:[#allocation2] sm:$0xff]  ;;  %v122_v13 = vld [vmem:[%s368_s3 + $0x18] sm:$0xff] }
  0x15   :  { %248 = vmatpush3.bf16.msra.mxu0 %v247_v5  ;;  %v256_v14 = vpack.c.bf16 %v122_v13, %v121_v12  ;;  %v210_v15 = vld [vmem:[%s367_s2] ss:$0 sm:$0xff] }
  0x16   :  { %249 = vmatprep.subr.bf16.mxu0 %v287_v0  ;;  %254 = vmatpush3.bf16.msra.mxu1 %v253_v10  ;;  %v212_v20 = vld [vmem:[%s369_s4] ss:$0 sm:$0xff] }
  0x17   :  { %255 = vmatprep.subr.bf16.mxu1 %v287_v0 }
  0x19   :  { %251 = vmatpush3.bf16.msra.mxu0 %v250_v9 }
  0x1a   :  { %257 = vmatpush3.bf16.msra.mxu1 %v256_v14 }
  0x1c   :  { %233 = vmatmul.mubr.msk.f32.vlgmr.msra.gmra.mrb[0].mxu0 %vm44_vm1, %v32_v11 }
  0xef   :  { %v114_v16 = vpop.f32.mrb[0].mxu0 }
  0xf0   :  { %v115_v17 = vadd.f32 %v210_v15, %v114_v16  ;;  %v234_v18 = vpop.f32.mrb[1].mxu0 }
  0xf2   :  { %v118_v19 = vmax.f32 %v115_v17, 0.0 }
  0xf4   :  { %244 = vmatmul.mubr.msk.f32.vlgmr.msra.gmra.mrb[0].mxu1 %vm44_vm1, %v118_v19 }
 0x1c7   :  { %v199_v21 = vpop.f32.mrb[0].mxu1 }
 0x1c8   :  { %v200_v22 = vadd.f32 %v212_v20, %v199_v21  ;;  %v245_v23 = vpop.f32.mrb[1].mxu1 }
 0x1ca   :  { %204 = vst.msk [vmem:[%s370_s5] sm:$0xff] %vm203_vm2, %v200_v22 }
 0x1cb   :  { %209 = vsyncpa [#allocation3], 1 }

</bundles_post_ra>
